<compile_context>
chip_gen: v7x
topology: tpu7x:2x2x1
jax: 0.10.0
libtpu: 0.0.40
codegen_flags: <defaults>
</compile_context>

<pallas_src>
import functools

import jax
import jax.numpy as jnp
from jax.experimental import pallas as pl
from jax.experimental.pallas import tpu as pltpu


def _tv_loss_kernel(x_ref, halo_ref, o_ref, *, weight, halo_rows):
    # x_ref:    (1, C, TH, W)         image rows [t*TH, t*TH + TH)
    # halo_ref: (1, C, halo_rows, W)  rows [t*TH - halo_rows, t*TH) (clamped for t == 0)
    # o_ref:    (1, TH, W)
    C = x_ref.shape[1]
    TH, W = x_ref.shape[2], x_ref.shape[3]

    # (TH, 1) "is this the first row of the tile" mask, hoisted out of the loop.
    row0 = jax.lax.broadcasted_iota(jnp.int32, (TH, 1), 0) == 0

    def body(c, acc):
        xc = x_ref[0, c].astype(jnp.float32)                          # (TH, W)
        prev = halo_ref[0, c][halo_rows - 1:, :].astype(jnp.float32)  # (1, W) = row above tile
        # Backward difference along H: x[r] - x[r-1].  Row 0 of the tile takes
        # its predecessor from the halo block (junk for the very first image
        # row, which is sliced off in the wrapper).
        x_up = pltpu.roll(xc, shift=1, axis=0)       # sublane rotate (XLU)
        x_up = jnp.where(row0, prev, x_up)
        dh = xc - x_up
        # Backward difference along W: x[:, j] - x[:, j-1].  Column 0 wraps
        # around and is junk; it is sliced off in the wrapper.
        dw = xc - pltpu.roll(xc, shift=1, axis=1)    # lane rotate (XLU)
        return acc + dh * dh + dw * dw

    acc = jax.lax.fori_loop(0, C, body, jnp.zeros((TH, W), jnp.float32),
                            unroll=C <= 8)
    o_ref[0] = (weight * acc).astype(o_ref.dtype)


def tv_loss(x, tv_loss_weight=1.0, tile_h=256):
    """Returns the (B, H-1, W-1) TV-loss map, matching the PyTorch TVLoss."""
    B, C, H, W = x.shape

    # H tile: whole image if small, otherwise an 8-aligned tile of rows.
    if H > tile_h and tile_h % 8 == 0:
        th = tile_h
    else:
        th = H
    halo_rows = min(8, H)
    n_h = pl.cdiv(H, th)
    blocks_per_tile = max(th // halo_rows, 1)

    # Size the scoped VMEM for double-buffered input/halo/output + f32 accumulator.
    itemsize = x.dtype.itemsize
    needed = 2 * (C * th * W + C * halo_rows * W + th * W) * itemsize + th * W * 4
    vmem_limit = int(min(max(needed * 5 // 4 + (2 << 20), 32 << 20), 64 << 20))

    kernel = functools.partial(_tv_loss_kernel, weight=tv_loss_weight,
                               halo_rows=halo_rows)

    full = pl.pallas_call(
        kernel,
        out_shape=jax.ShapeDtypeStruct((B, H, W), x.dtype),
        grid=(B, n_h),
        in_specs=[
            pl.BlockSpec((1, C, th, W), lambda b, i: (b, 0, i, 0)),
            pl.BlockSpec(
                (1, C, halo_rows, W),
                lambda b, i: (b, 0, jnp.maximum(i * blocks_per_tile - 1, 0), 0)),
        ],
        out_specs=pl.BlockSpec((1, th, W), lambda b, i: (b, i, 0)),
        compiler_params=pltpu.CompilerParams(
            dimension_semantics=("parallel", "parallel"),
            vmem_limit_bytes=vmem_limit,
        ),
    )(x, x)

    # Row 0 / column 0 of the slab are wrap-around junk; slicing them off
    # reproduces the PyTorch output exactly.
    return full[:, 1:, 1:]


def tv_loss_ref(x, tv_loss_weight=1.0):
    # Pure-JAX reference mirroring the PyTorch forward exactly.
    h_x, w_x = x.shape[2], x.shape[3]
    h_tv = (x[:, :, 1:, :] - x[:, :, : h_x - 1, :]) ** 2
    w_tv = (x[:, :, :, 1:] - x[:, :, :, : w_x - 1]) ** 2
    return tv_loss_weight * (h_tv[:, :, :, 1:] + w_tv[:, :, 1:, :]).sum(axis=1)


if __name__ == "__main__":
    key = jax.random.PRNGKey(0)
    B, C, H, W = 2, 4, 16, 128
    x = jax.random.normal(key, (B, C, H, W), dtype=jnp.float32)

    # Multi-tile path (exercises the H-tiling + halo logic): tile_h=8 -> 2 tiles.
    out_tiled = jax.block_until_ready(tv_loss(x, tv_loss_weight=0.5, tile_h=8))
    ref_tiled = tv_loss_ref(x, 0.5)
    assert out_tiled.shape == (B, H - 1, W - 1), out_tiled.shape
    assert jnp.allclose(out_tiled, ref_tiled, atol=1e-5, rtol=1e-5), "tiled mismatch"

    # Single-tile path (default tile_h covers the whole image).
    out_full = jax.block_until_ready(tv_loss(x, tv_loss_weight=1.0))
    ref_full = tv_loss_ref(x, 1.0)
    assert out_full.shape == (B, H - 1, W - 1), out_full.shape
    assert jnp.allclose(out_full, ref_full, atol=1e-5, rtol=1e-5), "full mismatch"

    print("KERNEL_OK")
</pallas_src>

<mosaic_0001>
module attributes {stable_mosaic.version = 11 : i64} {
  func.func @_tv_loss_kernel(%arg0: i32, %arg1: i32, %arg2: memref<1x4x8x128xf32, #tpu.memory_space<vmem>>, %arg3: memref<1x4x8x128xf32, #tpu.memory_space<vmem>>, %arg4: memref<1x8x128xf32, #tpu.memory_space<vmem>>) attributes {dimension_semantics = [#tpu.dimension_semantics<parallel>, #tpu.dimension_semantics<parallel>], iteration_bounds = array<i64: 2, 2>, scalar_prefetch = 0 : i64, scratch_operands = 0 : i64, tpu.core_type = #tpu.core_type<tc>, window_params = [{transform_indices = @transform_0, window_bounds = array<i64: 1, 4, 8, 128>}, {transform_indices = @transform_1, window_bounds = array<i64: 1, 4, 8, 128>}, {transform_indices = @transform_2, window_bounds = array<i64: 1, 8, 128>}]} {
    %0 = tpu.iota {dimensions = array<i32: 0>} : vector<8x1xi32>
    %c0_i32 = arith.constant 0 : i32
    %1 = vector.broadcast %c0_i32 : i32 to vector<8x1xi32>
    %2 = arith.cmpi eq, %0, %1 : vector<8x1xi32>
    %cst = arith.constant 0.000000e+00 : f32
    %3 = vector.broadcast %cst : f32 to vector<8x128xf32>
    %c0_i32_0 = arith.constant 0 : i32
    %c0 = arith.constant 0 : index
    %4 = arith.index_cast %c0_i32_0 : i32 to index
    %c0_1 = arith.constant 0 : index
    %c0_2 = arith.constant 0 : index
    %5 = vector.load %arg2[%c0, %4, %c0_1, %c0_2] : memref<1x4x8x128xf32, #tpu.memory_space<vmem>>, vector<1x1x8x128xf32>
    %6 = vector.shape_cast %5 : vector<1x1x8x128xf32> to vector<8x128xf32>
    %c0_3 = arith.constant 0 : index
    %7 = arith.index_cast %c0_i32_0 : i32 to index
    %c0_4 = arith.constant 0 : index
    %c0_5 = arith.constant 0 : index
    %8 = vector.load %arg3[%c0_3, %7, %c0_4, %c0_5] : memref<1x4x8x128xf32, #tpu.memory_space<vmem>>, vector<1x1x8x128xf32>
    %9 = vector.shape_cast %8 : vector<1x1x8x128xf32> to vector<8x128xf32>
    %10 = vector.extract_strided_slice %9 {offsets = [7, 0], sizes = [1, 128], strides = [1, 1]} : vector<8x128xf32> to vector<1x128xf32>
    %c1_i32 = arith.constant 1 : i32
    %11 = tpu.dynamic_rotate %6 by %c1_i32 dim 0 : vector<8x128xf32>, i32 -> vector<8x128xf32>
    %12 = vector.shape_cast %2 : vector<8x1xi1> to vector<8x1xi1>
    %13 = vector.broadcast %12 : vector<8x1xi1> to vector<8x128xi1>
    %14 = vector.shape_cast %10 : vector<1x128xf32> to vector<1x128xf32>
    %15 = vector.broadcast %14 : vector<1x128xf32> to vector<8x128xf32>
    %16 = arith.select %13, %15, %11 : vector<8x128xi1>, vector<8x128xf32>
    %17 = arith.subf %6, %16 : vector<8x128xf32>
    %c1_i32_6 = arith.constant 1 : i32
    %18 = tpu.dynamic_rotate %6 by %c1_i32_6 dim 1 : vector<8x128xf32>, i32 -> vector<8x128xf32>
    %19 = arith.subf %6, %18 : vector<8x128xf32>
    %20 = arith.mulf %17, %17 : vector<8x128xf32>
    %21 = arith.addf %3, %20 : vector<8x128xf32>
    %22 = arith.mulf %19, %19 : vector<8x128xf32>
    %23 = arith.addf %21, %22 : vector<8x128xf32>
    %c1_i32_7 = arith.constant 1 : i32
    %c0_8 = arith.constant 0 : index
    %24 = arith.index_cast %c1_i32_7 : i32 to index
    %c0_9 = arith.constant 0 : index
    %c0_10 = arith.constant 0 : index
    %25 = vector.load %arg2[%c0_8, %24, %c0_9, %c0_10] : memref<1x4x8x128xf32, #tpu.memory_space<vmem>>, vector<1x1x8x128xf32>
    %26 = vector.shape_cast %25 : vector<1x1x8x128xf32> to vector<8x128xf32>
    %c0_11 = arith.constant 0 : index
    %27 = arith.index_cast %c1_i32_7 : i32 to index
    %c0_12 = arith.constant 0 : index
    %c0_13 = arith.constant 0 : index
    %28 = vector.load %arg3[%c0_11, %27, %c0_12, %c0_13] : memref<1x4x8x128xf32, #tpu.memory_space<vmem>>, vector<1x1x8x128xf32>
    %29 = vector.shape_cast %28 : vector<1x1x8x128xf32> to vector<8x128xf32>
    %30 = vector.extract_strided_slice %29 {offsets = [7, 0], sizes = [1, 128], strides = [1, 1]} : vector<8x128xf32> to vector<1x128xf32>
    %c1_i32_14 = arith.constant 1 : i32
    %31 = tpu.dynamic_rotate %26 by %c1_i32_14 dim 0 : vector<8x128xf32>, i32 -> vector<8x128xf32>
    %32 = vector.shape_cast %2 : vector<8x1xi1> to vector<8x1xi1>
    %33 = vector.broadcast %32 : vector<8x1xi1> to vector<8x128xi1>
    %34 = vector.shape_cast %30 : vector<1x128xf32> to vector<1x128xf32>
    %35 = vector.broadcast %34 : vector<1x128xf32> to vector<8x128xf32>
    %36 = arith.select %33, %35, %31 : vector<8x128xi1>, vector<8x128xf32>
    %37 = arith.subf %26, %36 : vector<8x128xf32>
    %c1_i32_15 = arith.constant 1 : i32
    %38 = tpu.dynamic_rotate %26 by %c1_i32_15 dim 1 : vector<8x128xf32>, i32 -> vector<8x128xf32>
    %39 = arith.subf %26, %38 : vector<8x128xf32>
    %40 = arith.mulf %37, %37 : vector<8x128xf32>
    %41 = arith.addf %23, %40 : vector<8x128xf32>
    %42 = arith.mulf %39, %39 : vector<8x128xf32>
    %43 = arith.addf %41, %42 : vector<8x128xf32>
    %c2_i32 = arith.constant 2 : i32
    %c0_16 = arith.constant 0 : index
    %44 = arith.index_cast %c2_i32 : i32 to index
    %c0_17 = arith.constant 0 : index
    %c0_18 = arith.constant 0 : index
    %45 = vector.load %arg2[%c0_16, %44, %c0_17, %c0_18] : memref<1x4x8x128xf32, #tpu.memory_space<vmem>>, vector<1x1x8x128xf32>
    %46 = vector.shape_cast %45 : vector<1x1x8x128xf32> to vector<8x128xf32>
    %c0_19 = arith.constant 0 : index
    %47 = arith.index_cast %c2_i32 : i32 to index
    %c0_20 = arith.constant 0 : index
    %c0_21 = arith.constant 0 : index
    %48 = vector.load %arg3[%c0_19, %47, %c0_20, %c0_21] : memref<1x4x8x128xf32, #tpu.memory_space<vmem>>, vector<1x1x8x128xf32>
    %49 = vector.shape_cast %48 : vector<1x1x8x128xf32> to vector<8x128xf32>
    %50 = vector.extract_strided_slice %49 {offsets = [7, 0], sizes = [1, 128], strides = [1, 1]} : vector<8x128xf32> to vector<1x128xf32>
    %c1_i32_22 = arith.constant 1 : i32
    %51 = tpu.dynamic_rotate %46 by %c1_i32_22 dim 0 : vector<8x128xf32>, i32 -> vector<8x128xf32>
    %52 = vector.shape_cast %2 : vector<8x1xi1> to vector<8x1xi1>
    %53 = vector.broadcast %52 : vector<8x1xi1> to vector<8x128xi1>
    %54 = vector.shape_cast %50 : vector<1x128xf32> to vector<1x128xf32>
    %55 = vector.broadcast %54 : vector<1x128xf32> to vector<8x128xf32>
    %56 = arith.select %53, %55, %51 : vector<8x128xi1>, vector<8x128xf32>
    %57 = arith.subf %46, %56 : vector<8x128xf32>
    %c1_i32_23 = arith.constant 1 : i32
    %58 = tpu.dynamic_rotate %46 by %c1_i32_23 dim 1 : vector<8x128xf32>, i32 -> vector<8x128xf32>
    %59 = arith.subf %46, %58 : vector<8x128xf32>
    %60 = arith.mulf %57, %57 : vector<8x128xf32>
    %61 = arith.addf %43, %60 : vector<8x128xf32>
    %62 = arith.mulf %59, %59 : vector<8x128xf32>
    %63 = arith.addf %61, %62 : vector<8x128xf32>
    %c3_i32 = arith.constant 3 : i32
    %c0_24 = arith.constant 0 : index
    %64 = arith.index_cast %c3_i32 : i32 to index
    %c0_25 = arith.constant 0 : index
    %c0_26 = arith.constant 0 : index
    %65 = vector.load %arg2[%c0_24, %64, %c0_25, %c0_26] : memref<1x4x8x128xf32, #tpu.memory_space<vmem>>, vector<1x1x8x128xf32>
    %66 = vector.shape_cast %65 : vector<1x1x8x128xf32> to vector<8x128xf32>
    %c0_27 = arith.constant 0 : index
    %67 = arith.index_cast %c3_i32 : i32 to index
    %c0_28 = arith.constant 0 : index
    %c0_29 = arith.constant 0 : index
    %68 = vector.load %arg3[%c0_27, %67, %c0_28, %c0_29] : memref<1x4x8x128xf32, #tpu.memory_space<vmem>>, vector<1x1x8x128xf32>
    %69 = vector.shape_cast %68 : vector<1x1x8x128xf32> to vector<8x128xf32>
    %70 = vector.extract_strided_slice %69 {offsets = [7, 0], sizes = [1, 128], strides = [1, 1]} : vector<8x128xf32> to vector<1x128xf32>
    %c1_i32_30 = arith.constant 1 : i32
    %71 = tpu.dynamic_rotate %66 by %c1_i32_30 dim 0 : vector<8x128xf32>, i32 -> vector<8x128xf32>
    %72 = vector.shape_cast %2 : vector<8x1xi1> to vector<8x1xi1>
    %73 = vector.broadcast %72 : vector<8x1xi1> to vector<8x128xi1>
    %74 = vector.shape_cast %70 : vector<1x128xf32> to vector<1x128xf32>
    %75 = vector.broadcast %74 : vector<1x128xf32> to vector<8x128xf32>
    %76 = arith.select %73, %75, %71 : vector<8x128xi1>, vector<8x128xf32>
    %77 = arith.subf %66, %76 : vector<8x128xf32>
    %c1_i32_31 = arith.constant 1 : i32
    %78 = tpu.dynamic_rotate %66 by %c1_i32_31 dim 1 : vector<8x128xf32>, i32 -> vector<8x128xf32>
    %79 = arith.subf %66, %78 : vector<8x128xf32>
    %80 = arith.mulf %77, %77 : vector<8x128xf32>
    %81 = arith.addf %63, %80 : vector<8x128xf32>
    %82 = arith.mulf %79, %79 : vector<8x128xf32>
    %83 = arith.addf %81, %82 : vector<8x128xf32>
    %c4_i32 = arith.constant 4 : i32
    %cst_32 = arith.constant 5.000000e-01 : f32
    %84 = vector.broadcast %cst_32 : f32 to vector<8x128xf32>
    %85 = arith.mulf %84, %83 : vector<8x128xf32>
    %c0_33 = arith.constant 0 : index
    %c0_34 = arith.constant 0 : index
    %c0_35 = arith.constant 0 : index
    %86 = vector.load %arg4[%c0_33, %c0_34, %c0_35] : memref<1x8x128xf32, #tpu.memory_space<vmem>>, vector<1x8x128xf32>
    %87 = vector.shape_cast %86 : vector<1x8x128xf32> to vector<8x128xf32>
    %88 = vector.shape_cast %85 : vector<8x128xf32> to vector<1x8x128xf32>
    tpu.vector_store %arg4[%c0_33, %c0_34, %c0_35], %88 {strides = array<i32>} : memref<1x8x128xf32, #tpu.memory_space<vmem>>, vector<1x8x128xf32>,
    return
  }
  func.func @transform_0(%arg0: i32, %arg1: i32) -> (i32, i32, i32, i32) {
    %c0_i32 = arith.constant 0 : i32
    %c0_i32_0 = arith.constant 0 : i32
    %c0_i32_1 = arith.constant 0 : i32
    return %arg0, %c0_i32, %arg1, %c0_i32_0 : i32, i32, i32, i32
  }
  func.func @transform_1(%arg0: i32, %arg1: i32) -> (i32, i32, i32, i32) {
    %c1_i32 = arith.constant 1 : i32
    %0 = arith.muli %arg1, %c1_i32 : i32
    %c1_i32_0 = arith.constant 1 : i32
    %1 = arith.subi %0, %c1_i32_0 : i32
    %c0_i32 = arith.constant 0 : i32
    %2 = arith.maxsi %1, %c0_i32 : i32
    %c0_i32_1 = arith.constant 0 : i32
    %c0_i32_2 = arith.constant 0 : i32
    %c0_i32_3 = arith.constant 0 : i32
    return %arg0, %c0_i32_1, %2, %c0_i32_2 : i32, i32, i32, i32
  }
  func.func @transform_2(%arg0: i32, %arg1: i32) -> (i32, i32, i32) {
    %c0_i32 = arith.constant 0 : i32
    %c0_i32_0 = arith.constant 0 : i32
    return %arg0, %arg1, %c0_i32 : i32, i32, i32
  }
}

</mosaic_0001>

<bundles_post_ra>
// kernel: tpu_custom_call.1
= control target key start
LH: loop header
LB: loop body
LE: loop exit
PB: predicated region body
PF: predicated region fallthrough
CT: control target
= control target key end

     0   :  { %s1115_s0 = inlined_call_operand.hbm [shape: f32[2,4,16,128], index: 0, kind: input, shape index: {}]   ;;  %s1116_s1 = inlined_call_operand.hbm [shape: f32[2,4,16,128], index: 1, kind: input, shape index: {}]   ;;  %s1117_s2 = inlined_call_operand.hbm [shape: f32[2,16,128], index: 2, kind: output, shape index: {}]  }
   0x1   :  { %1130 = sst [smem:[#allocation13_spill]] %s1115_s0 }
   0x2   :  { %7 = vsyncpa [#allocation3], 0 }
   0x3   :  { %9 = vsyncpa [#allocation3 + $0x1], 0 }
   0x4   :  { %10 = vsyncpa [#allocation6], 0 }
   0x5   :  { %12 = vsyncpa [#allocation6 + $0x1], 0 }
   0x6   :  { %13 = vsyncpa [#allocation4], 0 }
   0x7   :  { %15 = vsyncpa [#allocation4 + $0x1], 0  ;;  %s787_s9 = smov 0   ;;  %s789_s10 = smov 0  }
   0x8   :  { %s791_s11 = smov 0   ;;  %s793_s12 = smov 0  }
   0x9   :  { %s795_s13 = smov 0   ;;  %s797_s14 = smov 0  }
   0xa   :  { %s799_s15 = smov 0   ;;  %s801_s16 = smov 0  }
   0xb   :  { %s803_s17 = smov 0   ;;  %s805_s18 = smov 0  }
   0xc   :  { %s807_s19 = smov 0  }
   0xd LB: > { %s437_s20 = sadd.s32 4294967295, %s763_s19   ;;  %s438_s21 = sadd.s32 4294967294, %s763_s19   ;;  %s763_s19 = sphi %s807_s19, %s21_s19   ;;  %s759_s18 = sphi %s805_s18, %s1168_s18   ;;  %s755_s17 = sphi %s803_s17, %s1167_s17   ;;  %s751_s16 = sphi %s801_s16, %s1166_s16   ;;  %s747_s15 = sphi %s799_s15, %s1165_s15   ;;  %s743_s14 = sphi %s797_s14, %s1164_s14   ;;  %s739_s13 = sphi %s795_s13, %s1163_s13   ;;  %s735_s12 = sphi %s793_s12, %s1162_s12   ;;  %s731_s11 = sphi %s791_s11, %s1161_s11   ;;  %s727_s10 = sphi %s789_s10, %s1160_s10   ;;  %s723_s9 = sphi %s787_s9, %s1159_s9  }
   0xe   : > { %s1118_s22 = sadd.s32 1, %s755_s17  ;;  %s33_s23 = sadd.s32 1, %s759_s18 }
   0xf   : > { %p848_p0 = scmp.ge.s32.totalorder %s1118_s22, 2  ;;  %p49_p1 = scmp.ne.s32.totalorder %s743_s14, %s739_s13 }
  0x10   : > { %p1121_p2 = scmp.eq.s32.totalorder %s763_s19, 0  ;;  %p55_p4 = scmp.ne.s32.totalorder %s739_s13, %s735_s12 }
  0x11   : > { %s1170_s23 = smov (!%p848_p0, %s33_s23), %s759_s18  ;;  %p869_p5 = scmp.eq.s32.totalorder %s437_s20, 0 }
  0x12   : > { %p863_p3 = por %p1121_p2, %p49_p1  ;;  %p115_p6 = scmp.eq.s32.totalorder %s437_s20, 3 }
  0x13   : > { %s1133_s27 = scalar_select %p869_p5, 1, 0 }
  0x14   : > { %p121_p7 = scmp.eq.s32.totalorder %s438_s21, 3  ;;  %p875_p8 = por %p869_p5, %p55_p4 }
  0x15   : > { %p879_p9 = por %p115_p6, %p49_p1  ;;  %p1120_p11 = scmp.lt.s32.totalorder %s763_s19, 4 }
  0x16   : > { %s1134_s28 = scalar_select %p875_p8, 1, 0 }
  0x17   : > { %s1135_s29 = scalar_select %p879_p9, 1, 0 }
  0x18   : > { %p883_p10 = por %p121_p7, %p55_p4  ;;  %s141_s3 = sand.u32 1, %s743_s14  }
  0x19   : > { %s444_s4 = sshll.u32 %s759_s18, 3  ;;  %s443_s5 = sshll.u32 %s141_s3, 5 }
  0x1a   : > { %s1136_s30 = scalar_select %p883_p10, 1, 0 }
  0x1b   : > { %s150_s6 = sadd.s32 %s755_s17, %s444_s4  ;;  %s145_s8 = scalar_lea.vmem [#allocation2], %s443_s5 }
  0x1c   : > { %1137 = sst [smem:[#allocation11_spill]] %s1136_s30  ;;  %s445_s7 = sshll.u32 %s150_s6, 7 }
  0x1d   : > { %s153_s20 = sshll.u32 %s145_s8, 4  ;;  %s1138_s0 = sld [smem:[#allocation13_spill]]  ;;  %s896_s20 = int_to_ptr.vmem [resolvable:$true] %s153_s20 }
  0x1e   : > { %p902_p12 = pnand %p1120_p11, %p863_p3  ;;  %s907_s4 = scalar_lea.sflag [#allocation3], %s141_s3 }
  0x20   : > { %p578_p4 = pneg %p902_p12 }
  0x23   : > { %s894_s22 = scalar_lea.hbm %s1138_s0, %s445_s7  ;;  %s581_s6 = scalar_lea.hbm %s1138_s0, 2048 }
  0x24   : > { %s576_s25 = scalar_lea.hbm %s894_s22, 512  ;;  %p582_p3 = scmp.lt.u32.totalorder %s894_s22, %s1138_s0 }
  0x25   : > { %p577_p1 = scmp.ne.s32.totalorder %s894_s22, %s576_s25  ;;  %p583_p11 = scmp.lt.u32.totalorder %s581_s6, %s576_s25 }
  0x26   : > { %p585_p13 = scmp.lt.u32.totalorder %s576_s25, %s894_s22 }
  0x27   : > { %p579_p6 = pnand %p578_p4, %p577_p1  ;;  %p584_p2 = por %p583_p11, %p582_p3 }
  0x29   : > { %p580_p7 = pneg %p579_p6  ;;  %p586_p10 = por %p585_p13, %p584_p2 }
  0x2b   : > { %p587_p9 = pnand %p586_p10, %p580_p7 }
  0x2d   : > { %590 = shalt.err (!%p587_p9)
}
  0x2e   : > { %s591_s3 = scalar_lea.vmem %s896_s20, 512  ;;  %s765_s21 = smov [#allocation2]  }
  0x2f   : > { %p592_p1 = scmp.ne.s32.totalorder %s896_s20, %s591_s3  ;;  %s596_s5 = sshll.u32 %s765_s21, 4  ;;  %s597_s5 = int_to_ptr.vmem [resolvable:$false] %s596_s5 }
  0x30   : > { %s598_s26 = scalar_lea.vmem %s597_s5, 1024  ;;  %p599_p5 = scmp.lt.s32.totalorder %s896_s20, %s597_s5 }
  0x31   : > { %p594_p6 = pnand %p592_p1, %p578_p4  ;;  %p600_p11 = scmp.lt.s32.totalorder %s598_s26, %s591_s3 }
  0x33   : > { %p595_p8 = pneg %p594_p6  ;;  %p601_p3 = por %p600_p11, %p599_p5 }
  0x35   : > { %p602_p2 = pnand %p601_p3, %p595_p8 }
  0x37   : > { %605 = shalt.err (!%p602_p2)
}
  0x38   : > { %s1125_s25 = smov 256   ;;  %s1126_s6 = smov 128  }
  0x39   : > { %s1127_s7 = smov 8   ;;  %p186_p5 = scmp.lt.s32.totalorder %s763_s19, 5 }
  0x3a   : > { %474 = dma.hbm_to_vmem [thread:$0]  (!%p902_p12), %s894_s22, 512, %s896_s20, %s907_s4, %s1125_s25, %s1126_s6, %s1127_s7  }
  0x3b   : > { %p1140_p8 = scmp.ge.s32.totalorder %s763_s19, 1  ;;  %s1142_s3 = sadd.s32 1, %s755_s17 }
  0x3c   : > { %s1172_s3 = smov (%p848_p0, %s1142_s3), 0  ;;  %p35_p10 = scmp.ge.s32.totalorder %s1170_s23, 2 }
  0x3d   : > { %p941_p9 = pnand %p1140_p8, %p186_p5  ;;  %s38_s30 = ssub.s32 %s755_s17, %s1172_s3 }
  0x3e   : > { %s1174_s23 = smov (%p35_p10, %s1170_s23), 0  ;;  %s76_s4 = sadd.s32 1, %s731_s11 }
  0x3f   : > { %1143 = sst [smem:[#allocation12_spill]] %s1174_s23  ;;  %s37_s22 = ssub.s32 %s759_s18, %s1174_s23 }
  0x40   : > { %s39_s20 = sor.u32 %s38_s30, %s37_s22  ;;  %s1144_s21 = sadd.s32 1, %s743_s14 }
  0x41   : > { %p40_p12 = scmp.eq.s32.totalorder %s39_s20, 0  ;;  %p83_p13 = scmp.ne.s32.totalorder %s731_s11, %s727_s10 }
  0x42   : > { %p89_p4 = scmp.ne.s32.totalorder %s727_s10, %s723_s9  ;;  %p74_p7 = scmp.eq.s32.totalorder %s37_s22, 0 }
  0x43   : > { %s963_s5 = scalar_select %p40_p12, %s743_s14, %s1144_s21  }
  0x44   : > { %p1145_p0 = scmp.ne.s32.totalorder %s1133_s27, 0  ;;  %s163_s26 = sand.u32 1, %s731_s11  }
  0x45   : > { %s977_s25 = scalar_select %p74_p7, %s731_s11, %s76_s4  }
  0x46   : > { %p971_p1 = por %p89_p4, %p1145_p0  ;;  %p1147_p6 = scmp.eq.s32.totalorder %s763_s19, 0 }
  0x47   : > { %s446_s30 = sshll.u32 %s163_s26, 5  ;;  %s720_s20 = sshll.u32 %s759_s18, 10 }
  0x48   : > { %s1146_s24 = scalar_select %p971_p1, 1, 0 }
  0x49   : > { %p85_p11 = por %p83_p13, %p1147_p6  ;;  %s167_s6 = scalar_lea.vmem [#allocation5], %s446_s30 }
  0x4a   : > { %s178_s7 = sshll.u32 %s167_s6, 4  ;;  %s985_s23 = scalar_lea.hbm %s1116_s1, %s720_s20  ;;  %s987_s7 = int_to_ptr.vmem [resolvable:$true] %s178_s7 }
  0x4b   : > { %p1148_p3 = scmp.lt.s32.totalorder %s763_s19, 4  ;;  %s995_s27 = scalar_lea.sflag [#allocation6], %s163_s26 }
  0x4c   : > { %s606_s6 = scalar_lea.hbm %s985_s23, 512  ;;  %s611_s4 = scalar_lea.hbm %s1116_s1, 2048 }
  0x4d   : > { %p991_p2 = pnand %p1148_p3, %p85_p11  ;;  %p607_p5 = scmp.ne.s32.totalorder %s985_s23, %s606_s6 }
  0x4e   : > { %p612_p13 = scmp.lt.u32.totalorder %s985_s23, %s1116_s1  ;;  %p613_p4 = scmp.lt.u32.totalorder %s611_s4, %s606_s6 }
  0x4f   : > { %p608_p8 = pneg %p991_p2  ;;  %p615_p0 = scmp.lt.u32.totalorder %s606_s6, %s985_s23 }
  0x50   : > { %p614_p7 = por %p613_p4, %p612_p13 }
  0x51   : > { %p609_p10 = pnand %p608_p8, %p607_p5 }
  0x52   : > { %p616_p6 = por %p615_p0, %p614_p7 }
  0x53   : > { %p610_p12 = pneg %p609_p10 }
  0x55   : > { %p617_p11 = pnand %p616_p6, %p610_p12 }
  0x57   : > { %620 = shalt.err (!%p617_p11)
}
  0x58   : > { %s621_s26 = scalar_lea.vmem %s987_s7, 512  ;;  %s769_s21 = smov [#allocation5]  }
  0x59   : > { %p622_p3 = scmp.ne.s32.totalorder %s987_s7, %s621_s26  ;;  %s626_s0 = sshll.u32 %s769_s21, 4  ;;  %s627_s0 = int_to_ptr.vmem [resolvable:$false] %s626_s0 }
  0x5a   : > { %s628_s22 = scalar_lea.vmem %s627_s0, 1024  ;;  %p629_p1 = scmp.lt.s32.totalorder %s987_s7, %s627_s0 }
  0x5b   : > { %p624_p5 = pnand %p622_p3, %p608_p8  ;;  %p630_p13 = scmp.lt.s32.totalorder %s628_s22, %s621_s26 }
  0x5d   : > { %p625_p10 = pneg %p624_p5  ;;  %p631_p4 = por %p630_p13, %p629_p1 }
  0x5f   : > { %p632_p7 = pnand %p631_p4, %p625_p10 }
  0x61   : > { %635 = shalt.err (!%p632_p7)
}
  0x62   : > { %s1150_s6 = smov 8   ;;  %s1151_s4 = smov 128  }
  0x63   : > { %s1152_s30 = smov 256   ;;  %190 = sbr.rel (%p941_p9) target bundleno = 261 (0x105), region = 28 }
  0x64   : > { %477 = dma.hbm_to_vmem [thread:$0]  (!%p991_p2), %s985_s23, 512, %s987_s7, %s995_s27, %s1152_s30, %s1151_s4, %s1150_s6  }
  0x65   : > { %s1029_s20 = sand.u32 (!%p941_p9), 1, %s739_s13   ;;  %p1153_p1 = scmp.ne.s32.totalorder (!%p941_p9), %s1134_s28, 0 }
  0x66   : > { %s451_s26 = sshll.u32 (!%p941_p9), %s1029_s20, 5  ;;  %s193_s21 = scalar_lea.sflag (!%p941_p9), [#allocation3], %s1029_s20 }
  0x67   : > { %s196_s0 = scalar_lea.vmem (!%p941_p9), [#allocation2], %s451_s26 }
  0x6a   : > { %709 = dma.done.wait (%p1153_p1), %s193_s21, 512  }
  0x6b   : > { %711 = vsyncadd (%p1153_p1), %s193_s21, 4294966784  ;;  %s201_s23 = sand.u32 1, %s727_s10   ;;  %p1154_p9 = scmp.ne.s32.totalorder %s1146_s24, 0 }
  0x6c   : > { %s452_s7 = sshll.u32 %s201_s23, 5  ;;  %s202_s8 = scalar_lea.sflag [#allocation6], %s201_s23 }
  0x6d   : > { %s205_s9 = scalar_lea.vmem [#allocation5], %s452_s7 }
  0x6e   : > { %713 = dma.done.wait (%p1154_p9), %s202_s8, 512  }
  0x6f   : > { %715 = vsyncadd (%p1154_p9), %s202_s8, 4294966784  ;;  %v237_v0 = vld [vmem:[%s196_s0] sm:$0xff]  ;;  %v456_v1 = vld [vmem:[%s196_s0 + $0x10] sm:$0xff]  ;;  %s770_s27 = smov 1   ;;  %v234_v4 = vlaneseq  ;;  %s453_s28 = sshll.u32 %s1029_s20, 3 }
  0x70   : > { %248 = vrot.lane.b32.xlu0 %v237_v0, %s770_s27  ;;  %284 = vrot.lane.b32.xlu1 %v456_v1, %s770_s27  ;;  %v454_v2 = vld [vmem:[%s196_s0 + $0x8] sm:$0xff]  ;;  %v458_v3 = vld [vmem:[%s196_s0 + $0x18] sm:$0xff]  ;;  %v239_v9 = vrot.slane %v237_v0, 7  ;;  %v277_v15 = vrot.slane %v456_v1, 7  ;;  %s461_s24 = sshll.u32 %s751_s16, 1  ;;  %s230_s4 = scalar_lea.vmem [#allocation7], %s453_s28 }
  0x71   : > { %v235_v5 = vshrl.u32 %v234_v4, 7  ;;  %v238_v7 = vld [vmem:[%s205_s9] sm:$0xff]  ;;  %v455_v8 = vld [vmem:[%s205_s9 + $0x8] sm:$0xff]  ;;  %v259_v11 = vrot.slane %v454_v2, 7  ;;  %v457_v13 = vld [vmem:[%s205_s9 + $0x10] sm:$0xff]  ;;  %v295_v21 = vrot.slane %v458_v3, 7  ;;  %s323_s22 = sadd.s32 %s747_s15, %s461_s24 }
  0x72   : > { %v459_v19 = vld [vmem:[%s205_s9 + $0x18] sm:$0xff]  ;;  %s462_s6 = sshll.u32 %s323_s22, 7  ;;  %s327_s30 = sshll.u32 %s230_s4, 4  ;;  %s1054_s30 = int_to_ptr.vmem [resolvable:$true] %s327_s30 }
  0x73   : > { %v244_v6 = vsub.s32 7, %v235_v5  ;;  %vm236_vm0 = vcmp.eq.s32.totalorder %v235_v5, 0  ;;  %s1052_s0 = scalar_lea.hbm %s1117_s2, %s462_s6  ;;  %s312_s16 = scalar_lea.sflag [#allocation4], %s1029_s20 }
  0x74   : > { %266 = vrot.lane.b32.xlu0 %v454_v2, %s770_s27  ;;  %302 = vrot.lane.b32.xlu1 %v458_v3, %s770_s27  ;;  %s636_s23 = scalar_lea.vmem %s1054_s30, 128  ;;  %p1155_p8 = scmp.ne.s32.totalorder %s1135_s29, 0 }
  0x75   : > { %v245_v10 = vrot.slane %v238_v7, %v244_v6  ;;  %v263_v12 = vrot.slane %v455_v8, %v244_v6  ;;  %v281_v17 = vrot.slane %v457_v13, %v244_v6  ;;  %v299_v25 = vrot.slane %v459_v19, %v244_v6  ;;  %p637_p2 = scmp.ne.s32.totalorder %s1054_s30, %s636_s23  ;;  %s771_s15 = smov [#allocation7]  }
  0x76   : > { %s640_s7 = sshll.u32 %s771_s15, 4  ;;  %s641_s7 = int_to_ptr.vmem [resolvable:$false] %s640_s7 }
  0x77   : > { %v246_v14 = vsel %vm236_vm0, %v245_v10, %v239_v9  ;;  %v264_v16 = vsel %vm236_vm0, %v263_v12, %v259_v11  ;;  %v282_v24 = vsel %vm236_vm0, %v281_v17, %v277_v15  ;;  %v300_v32 = vsel %vm236_vm0, %v299_v25, %v295_v21  ;;  %p638_p12 = pnand %p637_p2, %p1155_p8  ;;  %s642_s8 = scalar_lea.vmem %s641_s7, 256 }
  0x78   : > { %v247_v18 = vsub.f32 %v237_v0, %v246_v14  ;;  %v265_v20 = vsub.f32 %v454_v2, %v264_v16  ;;  %v283_v30 = vsub.f32 %v456_v1, %v282_v24  ;;  %v301_v40 = vsub.f32 %v458_v3, %v300_v32  ;;  %p643_p6 = scmp.lt.s32.totalorder %s1054_s30, %s641_s7  ;;  %p644_p11 = scmp.lt.s32.totalorder %s642_s8, %s636_s23 }
  0x79   : > { %p639_p0 = pneg %p638_p12 }
  0x7a   : > { %v251_v27 = vmul.f32 %v247_v18, %v247_v18  ;;  %v269_v29 = vmul.f32 %v265_v20, %v265_v20  ;;  %v287_v39 = vmul.f32 %v283_v30, %v283_v30  ;;  %v305_v45 = vmul.f32 %v301_v40, %v301_v40  ;;  %p645_p3 = por %p644_p11, %p643_p6 }
  0x7c   : > { %p646_p5 = pnand %p645_p3, %p639_p0 }
  0xe2   : > { %v249_v22 = vpop.permute.xlu0 %248  ;;  %v285_v23 = vpop.permute.xlu1 %284 }
  0xe3   : > { %v250_v26 = vsub.f32 %v237_v0, %v249_v22  ;;  %v286_v35 = vsub.f32 %v456_v1, %v285_v23 }
  0xe5   : > { %v253_v28 = vmul.f32 %v250_v26, %v250_v26  ;;  %v289_v42 = vmul.f32 %v286_v35, %v286_v35 }
  0xe6   : > { %v267_v31 = vpop.permute.xlu0 %266  ;;  %v303_v36 = vpop.permute.xlu1 %302 }
  0xe7   : > { %v254_v33 = vadd.f32 %v253_v28, %v251_v27  ;;  %v268_v34 = vsub.f32 %v454_v2, %v267_v31  ;;  %v304_v43 = vsub.f32 %v458_v3, %v303_v36 }
  0xe9   : > { %v270_v37 = vadd.f32 %v269_v29, %v254_v33  ;;  %v271_v38 = vmul.f32 %v268_v34, %v268_v34  ;;  %v307_v47 = vmul.f32 %v304_v43, %v304_v43 }
  0xeb   : > { %v272_v41 = vadd.f32 %v271_v38, %v270_v37 }
  0xed   : > { %v288_v44 = vadd.f32 %v287_v39, %v272_v41 }
  0xef   : > { %v290_v46 = vadd.f32 %v289_v42, %v288_v44 }
  0xf1   : > { %v306_v48 = vadd.f32 %v305_v45, %v290_v46 }
  0xf3   : > { %v308_v49 = vadd.f32 %v307_v47, %v306_v48 }
  0xf5   : > { %v309_v50 = vmul.f32 0.5, %v308_v49 }
  0xf7   : > { %310 = vst [vmem:[%s230_s4] sm:$0xff] %v309_v50 }
  0xf8   : > { %649 = shalt.err (!%p646_p5)
}
  0xf9   : > { %s650_s20 = scalar_lea.hbm %s1052_s0, 128  ;;  %s654_s28 = scalar_lea.hbm %s1117_s2, 512 }
  0xfa   : > { %p651_p10 = scmp.ne.s32.totalorder %s1052_s0, %s650_s20  ;;  %p655_p7 = scmp.lt.u32.totalorder %s1052_s0, %s1117_s2 }
  0xfb   : > { %p656_p1 = scmp.lt.u32.totalorder %s654_s28, %s650_s20  ;;  %p658_p2 = scmp.lt.u32.totalorder %s650_s20, %s1052_s0 }
  0xfc   : > { %p652_p13 = pnand %p651_p10, %p1155_p8 }
  0xfd   : > { %p657_p9 = por %p656_p1, %p655_p7 }
  0xfe   : > { %p653_p4 = pneg %p652_p13 }
  0xff   : > { %p659_p12 = por %p658_p2, %p657_p9 }
 0x101   : > { %p660_p0 = pnand %p659_p12, %p653_p4 }
 0x103   : > { %663 = shalt.err (!%p660_p0)
}
 0x104   : > { %469 = dma.vmem_to_hbm [thread:$0]  (%p1155_p8), %s1054_s30, 128, %s1052_s0, %s312_s16  }
 0x105 PF: > { %s1156_s6 = sld [smem:[#allocation11_spill]]  ;;  %p483_p6 = scmp.ge.s32.totalorder %s763_s19, 2 }
 0x106   : > { %s339_s4 = sand.u32 1, %s735_s12  }
 0x107   : > { %s340_s26 = scalar_lea.sflag [#allocation4], %s339_s4 }
 0x10b   : > { %p1157_p11 = scmp.ne.s32.totalorder %s1156_s6, 0 }
 0x10d   : > { %p479_p3 = pnand %p483_p6, %p1157_p11 }
 0x10f   : > { %717 = dma.done.wait (!%p479_p3), %s340_s26, 128  }
 0x110   : > { %719 = vsyncadd (!%p479_p3), %s340_s26, 4294967168  ;;  %s21_s19 = sadd.s32 1, %s763_s19   ;;  %s1158_s29 = sld [smem:[#allocation12_spill]] }
 0x111   : > { %p18_p5 = scmp.ge.s32.totalorder %s21_s19, 6   ;;  %s1159_s9 = smov %s727_s10 }
 0x112   : > { %s1160_s10 = smov %s731_s11  ;;  %s1161_s11 = smov %s977_s25 }
 0x113   : > { %s1162_s12 = smov %s739_s13  ;;  %s1163_s13 = smov %s743_s14 }
 0x114   : > { %s1164_s14 = smov %s963_s5  ;;  %s1165_s15 = smov %s755_s17 }
 0x115   : > { %s1166_s16 = smov %s759_s18  ;;  %s1167_s17 = smov %s1172_s3 }
 0x116   : > { %s1168_s18 = smov %s1158_s29  ;;  %20 = sbr.rel (!%p18_p5) target bundleno = 13 (0xd), region = 92 }
 0x11d   :  { %345 = vsyncpa [#allocation3], 1 }
 0x11e   :  { %347 = vsyncpa [#allocation3 + $0x1], 1 }
 0x11f   :  { %348 = vsyncpa [#allocation6], 1 }
 0x120   :  { %350 = vsyncpa [#allocation6 + $0x1], 1 }
 0x121   :  { %351 = vsyncpa [#allocation4], 1 }
 0x122   :  { %353 = vsyncpa [#allocation4 + $0x1], 1 }

</bundles_post_ra>
